<compile_context>
chip_gen: v7x
topology: tpu7x:2x2x1
jax: 0.10.0
libtpu: 0.0.40
codegen_flags: <defaults>
</compile_context>

<pallas_src>
import jax
import jax.numpy as jnp
from jax.experimental import pallas as pl
from jax.experimental.pallas import tpu as pltpu


def _round_up(a: int, b: int) -> int:
    return (a + b - 1) // b * b


def _lora_kernel(x_ref, wd_ref, wu_ref, o_ref):
    # x_ref : (tm, c_pad)   wd_ref : (c_pad, r_pad)   wu_ref : (r_pad, c_pad)
    # o_ref : (tm, c_pad)
    x = x_ref[...]
    # Down projection: plain [M,K]x[K,N] -> (tm, r_pad), f32 accumulation.
    h = jnp.dot(x, wd_ref[...], preferred_element_type=jnp.float32)
    # Up projection: keep h in f32 (rank is tiny, MXU cost negligible here).
    y = jnp.dot(h, wu_ref[...], preferred_element_type=jnp.float32)
    o_ref[...] = y.astype(o_ref.dtype)


def _weight_spec(shape):
    """Grid-invariant weight block: single-buffered to reclaim VMEM."""
    try:
        return pl.BlockSpec(shape, lambda i: (0, 0), pipeline_mode=pl.Buffered(1))
    except TypeError:  # jax versions without BlockSpec.pipeline_mode
        return pl.BlockSpec(shape, lambda i: (0, 0))


def _vmem_capacity_bytes() -> int:
    """Per-core VMEM capacity; conservative (v7x-sized) fallback if unknown."""
    try:
        info = pltpu.get_tpu_info()
        cap = int(getattr(info, "vmem_capacity_bytes"))
        if cap > 0:
            return cap
    except Exception:
        pass
    return 64 << 20


def lora_forward(x, w_down, w_up, *, tm=None):
    """Fused LoRA forward: lora_up(lora_down(x)).

    x      : [..., c_in]
    w_down : (rank, c_in)  -- nn.Linear(c_in, rank, bias=False).weight
    w_up   : (c_in, rank)  -- nn.Linear(rank, c_in, bias=False).weight
    """
    orig_shape = x.shape
    c_in = orig_shape[-1]
    rank = w_down.shape[0]
    assert w_down.shape == (rank, c_in)
    assert w_up.shape == (c_in, rank)

    out_dtype = x.dtype
    itemsize = jnp.dtype(out_dtype).itemsize
    w_itemsize = jnp.dtype(w_down.dtype).itemsize

    xm = x.reshape(-1, c_in)
    M = xm.shape[0]

    # Lane-dense feature axis (multiple of 128); rank padded to 8 sublanes.
    c_pad = _round_up(c_in, 128)
    r_pad = _round_up(rank, 8)

    # One-time weight transpose (tiny) so both matmuls feed the MXU natively.
    wd_t = jnp.swapaxes(w_down, 0, 1)   # (c_in, rank)
    wu_t = jnp.swapaxes(w_up, 0, 1)     # (rank, c_in)
    if c_pad != c_in or r_pad != rank:
        wd_t = jnp.pad(wd_t, ((0, c_pad - c_in), (0, r_pad - rank)))
        wu_t = jnp.pad(wu_t, ((0, r_pad - rank), (0, c_pad - c_in)))
    if c_pad != c_in:
        xm = jnp.pad(xm, ((0, 0), (0, c_pad - c_in)))

    vmem_cap = _vmem_capacity_bytes()

    # Row tile sizing: HBM-bound kernel, so make blocks big enough to amortize
    # the ~0.35us/step grid overhead, but keep >= ~8 grid steps when M allows
    # (megacore on v7x + DMA/compute overlap) and respect the VMEM budget.
    if tm is None:
        target_bytes = (8 << 20) if vmem_cap >= (100 << 20) else (3 << 20)
        tm = max(32, min(2048, target_bytes // max(1, c_pad * itemsize)))
        tm = min(tm, max(32, _round_up(pl.cdiv(M, 8), 32)))
    tm = max(32, _round_up(int(tm), 32))
    tm = min(tm, _round_up(M, 32))      # don't make the tile bigger than needed

    grid = (pl.cdiv(M, tm),)            # ragged last tile is masked by Pallas

    # VMEM budget from the real working set:
    #   double-buffered x + out tiles, resident weights in their padded
    #   (sublane, lane) layout, and the f32 (tm, c_pad) epilogue intermediate.
    block_bytes = tm * c_pad * itemsize
    wd_vmem = _round_up(c_pad, 8) * _round_up(r_pad, 128) * w_itemsize
    wu_vmem = _round_up(r_pad, 8) * c_pad * w_itemsize
    f32_epilogue = tm * c_pad * 4
    working = 4 * block_bytes + wd_vmem + wu_vmem + f32_epilogue
    vmem_limit = int(min(working + (8 << 20), int(vmem_cap * 0.8)))
    vmem_limit = max(vmem_limit, 16 << 20)

    out = pl.pallas_call(
        _lora_kernel,
        out_shape=jax.ShapeDtypeStruct((M, c_pad), out_dtype),
        grid_spec=pltpu.PrefetchScalarGridSpec(
            num_scalar_prefetch=0,
            grid=grid,
            in_specs=[
                pl.BlockSpec((tm, c_pad), lambda i: (i, 0)),   # x row tile
                _weight_spec((c_pad, r_pad)),                  # lora_down.weight^T
                _weight_spec((r_pad, c_pad)),                  # lora_up.weight^T
            ],
            out_specs=pl.BlockSpec((tm, c_pad), lambda i: (i, 0)),
        ),
        compiler_params=pltpu.CompilerParams(
            dimension_semantics=("parallel",),
            vmem_limit_bytes=vmem_limit,
        ),
    )(xm, wd_t, wu_t)

    if c_pad != c_in:
        out = out[:, :c_in]
    return out.reshape(orig_shape)


if __name__ == "__main__":
    # Small shapes consistent with the module: LoRA over hidden dim c_in.
    batch, seq, c_in, rank = 2, 8, 32, 8

    key = jax.random.PRNGKey(0)
    kx, kd, ku = jax.random.split(key, 3)

    x = jax.random.normal(kx, (batch, seq, c_in), dtype=jnp.float32)
    # Deterministic "kaiming-uniform-ish" init matching nn.Linear weight shapes.
    w_down = jax.random.uniform(kd, (rank, c_in), dtype=jnp.float32,
                                minval=-1.0, maxval=1.0) * (1.0 / (c_in ** 0.5))
    w_up = jax.random.uniform(ku, (c_in, rank), dtype=jnp.float32,
                              minval=-1.0, maxval=1.0) * (1.0 / (rank ** 0.5))

    y = lora_forward(x, w_down, w_up)
    y = jax.block_until_ready(y)

    # Correctness check against plain-JAX reference of the PyTorch forward.
    ref = (x @ w_down.T) @ w_up.T
    assert y.shape == x.shape
    assert jnp.allclose(y, ref, atol=1e-5, rtol=1e-5), \
        float(jnp.max(jnp.abs(y - ref)))

    print("KERNEL_OK")
</pallas_src>

<mosaic_0001>
module attributes {stable_mosaic.version = 11 : i64} {
  func.func @_lora_kernel(%arg0: i32, %arg1: memref<32x128xf32, #tpu.memory_space<vmem>>, %arg2: memref<128x8xf32, #tpu.memory_space<vmem>>, %arg3: memref<8x128xf32, #tpu.memory_space<vmem>>, %arg4: memref<32x128xf32, #tpu.memory_space<vmem>>) attributes {dimension_semantics = [#tpu.dimension_semantics<parallel>], iteration_bounds = array<i64: 1>, scalar_prefetch = 0 : i64, scratch_operands = 0 : i64, tpu.core_type = #tpu.core_type<tc>, window_params = [{transform_indices = @transform_0, window_bounds = array<i64: 32, 128>}, {pipeline_mode = #tpu.pipeline_mode<synchronous>, transform_indices = @transform_1, window_bounds = array<i64: 128, 8>}, {pipeline_mode = #tpu.pipeline_mode<synchronous>, transform_indices = @transform_2, window_bounds = array<i64: 8, 128>}, {transform_indices = @transform_3, window_bounds = array<i64: 32, 128>}]} {
    %c0 = arith.constant 0 : index
    %c0_0 = arith.constant 0 : index
    %0 = vector.load %arg1[%c0, %c0_0] : memref<32x128xf32, #tpu.memory_space<vmem>>, vector<32x128xf32>
    %c0_1 = arith.constant 0 : index
    %c0_2 = arith.constant 0 : index
    %1 = vector.load %arg2[%c0_1, %c0_2] : memref<128x8xf32, #tpu.memory_space<vmem>>, vector<128x8xf32>
    %cst = arith.constant dense<0.000000e+00> : vector<32x8xf32>
    %2 = tpu.matmul %0, %1, %cst {dimension_numbers = #tpu.dot_dimension_numbers<[1], [0], [0], [1], [0, 0, 1, 1], [], []>} : vector<32x128xf32>, vector<128x8xf32>, vector<32x8xf32> -> vector<32x8xf32>
    %c0_3 = arith.constant 0 : index
    %c0_4 = arith.constant 0 : index
    %3 = vector.load %arg3[%c0_3, %c0_4] : memref<8x128xf32, #tpu.memory_space<vmem>>, vector<8x128xf32>
    %cst_5 = arith.constant dense<0.000000e+00> : vector<32x128xf32>
    %4 = tpu.matmul %2, %3, %cst_5 {dimension_numbers = #tpu.dot_dimension_numbers<[1], [0], [0], [1], [0, 0, 1, 1], [], []>} : vector<32x8xf32>, vector<8x128xf32>, vector<32x128xf32> -> vector<32x128xf32>
    %c0_6 = arith.constant 0 : index
    %c0_7 = arith.constant 0 : index
    %5 = vector.load %arg4[%c0_6, %c0_7] : memref<32x128xf32, #tpu.memory_space<vmem>>, vector<32x128xf32>
    tpu.vector_store %arg4[%c0_6, %c0_7], %4 {strides = array<i32>} : memref<32x128xf32, #tpu.memory_space<vmem>>, vector<32x128xf32>,
    return
  }
  func.func @transform_0(%arg0: i32) -> (i32, i32) {
    %c0_i32 = arith.constant 0 : i32
    %c0_i32_0 = arith.constant 0 : i32
    return %arg0, %c0_i32 : i32, i32
  }
  func.func @transform_1(%arg0: i32) -> (i32, i32) {
    %c0_i32 = arith.constant 0 : i32
    %c0_i32_0 = arith.constant 0 : i32
    %c0_i32_1 = arith.constant 0 : i32
    return %c0_i32, %c0_i32_0 : i32, i32
  }
  func.func @transform_2(%arg0: i32) -> (i32, i32) {
    %c0_i32 = arith.constant 0 : i32
    %c0_i32_0 = arith.constant 0 : i32
    %c0_i32_1 = arith.constant 0 : i32
    return %c0_i32, %c0_i32_0 : i32, i32
  }
  func.func @transform_3(%arg0: i32) -> (i32, i32) {
    %c0_i32 = arith.constant 0 : i32
    %c0_i32_0 = arith.constant 0 : i32
    return %arg0, %c0_i32 : i32, i32
  }
}

</mosaic_0001>

<bundles_post_ra>
// kernel: tpu_custom_call.1
= control target key start
LH: loop header
LB: loop body
LE: loop exit
PB: predicated region body
PF: predicated region fallthrough
CT: control target
= control target key end

     0   :  { %8 = vsyncpa [#allocation3], 0  ;;  %vm121_vm0 = vcmask 64512   ;;  %s471_s0 = inlined_call_operand.vmem [shape: f32[16,128], index: 0, kind: input, shape index: {}]   ;;  %s472_s1 = inlined_call_operand.vmem [shape: f32[128,8], index: 1, kind: input, shape index: {}]   ;;  %s473_s2 = inlined_call_operand.vmem [shape: f32[8,128], index: 2, kind: input, shape index: {}]   ;;  %s474_s3 = inlined_call_operand.hbm [shape: f32[16,128], index: 3, kind: output, shape index: {}]  }
   0x1   :  { %v19_v0 = vld [vmem:[%s472_s1] sm:$0xff]  ;;  %v20_v1 = vld [vmem:[%s472_s1 + $0x8] sm:$0xff]  ;;  %v21_v3 = vld [vmem:[%s472_s1 + $0x10] sm:$0xff] }
   0x2   :  { %v314_v2 = vpack.c.bf16 %v20_v1, %v19_v0  ;;  %v22_v4 = vld [vmem:[%s472_s1 + $0x18] sm:$0xff]  ;;  %v23_v6 = vld [vmem:[%s472_s1 + $0x20] sm:$0xff]  ;;  %v24_v7 = vld [vmem:[%s472_s1 + $0x28] sm:$0xff] }
   0x3   :  { %v318_v5 = vpack.c.bf16 %v22_v4, %v21_v3  ;;  %v322_v8 = vpack.c.bf16 %v24_v7, %v23_v6  ;;  %v15_v9 = vld [vmem:[%s471_s0] sm:$0xff]  ;;  %v25_v10 = vld [vmem:[%s472_s1 + $0x30] sm:$0xff]  ;;  %v26_v11 = vld [vmem:[%s472_s1 + $0x38] sm:$0xff] }
   0x4   :  { %315 = vmatprep.subr.bf16.mxu0 %v314_v2  ;;  %300 = vmatprep.mubr.f32.mxu0 %v15_v9  ;;  %v326_v12 = vpack.c.bf16 %v26_v11, %v25_v10  ;;  %v27_v13 = vld [vmem:[%s472_s1 + $0x40] sm:$0xff]  ;;  %v28_v14 = vld [vmem:[%s472_s1 + $0x48] sm:$0xff]  ;;  %v29_v16 = vld [vmem:[%s472_s1 + $0x50] sm:$0xff] }
   0x5   :  { %317 = vmatpush3.bf16.msra.mxu0 %v314_v2  ;;  %v330_v15 = vpack.c.bf16 %v28_v14, %v27_v13  ;;  %v30_v17 = vld [vmem:[%s472_s1 + $0x58] sm:$0xff]  ;;  %v31_v19 = vld [vmem:[%s472_s1 + $0x60] sm:$0xff]  ;;  %v32_v20 = vld [vmem:[%s472_s1 + $0x68] sm:$0xff] }
   0x6   :  { %319 = vmatprep.subr.bf16.mxu0 %v318_v5  ;;  %v334_v18 = vpack.c.bf16 %v30_v17, %v29_v16  ;;  %v338_v21 = vpack.c.bf16 %v32_v20, %v31_v19  ;;  %v33_v22 = vld [vmem:[%s472_s1 + $0x70] sm:$0xff]  ;;  %v34_v23 = vld [vmem:[%s472_s1 + $0x78] sm:$0xff]  ;;  %v16_v25 = vld [vmem:[%s471_s0 + $0x8] sm:$0xff] }
   0x7   :  { %v342_v24 = vpack.c.bf16 %v34_v23, %v33_v22  ;;  %v17_v26 = vld [vmem:[%s471_s0 + $0x10] sm:$0xff]  ;;  %v18_v27 = vld [vmem:[%s471_s0 + $0x18] sm:$0xff]  ;;  %v120_v28 = vld [vmem:[%s473_s2] sm:$0xff] }
   0x8   :  { %306 = vmatprep.subr.mxu1 %v120_v28 }
   0x9   :  { %321 = vmatpush3.bf16.msra.mxu0 %v318_v5  ;;  %307 = vmatpush3.msra.mxu1 %v120_v28 }
   0xa   :  { %323 = vmatprep.subr.bf16.mxu0 %v322_v8 }
   0xd   :  { %325 = vmatpush3.bf16.msra.mxu0 %v322_v8 }
   0xe   :  { %327 = vmatprep.subr.bf16.mxu0 %v326_v12 }
  0x11   :  { %329 = vmatpush3.bf16.msra.mxu0 %v326_v12 }
  0x12   :  { %331 = vmatprep.subr.bf16.mxu0 %v330_v15 }
  0x15   :  { %333 = vmatpush3.bf16.msra.mxu0 %v330_v15 }
  0x16   :  { %335 = vmatprep.subr.bf16.mxu0 %v334_v18 }
  0x19   :  { %337 = vmatpush3.bf16.msra.mxu0 %v334_v18 }
  0x1a   :  { %339 = vmatprep.subr.bf16.mxu0 %v338_v21 }
  0x1d   :  { %341 = vmatpush3.bf16.msra.mxu0 %v338_v21 }
  0x1e   :  { %343 = vmatprep.subr.bf16.mxu0 %v342_v24 }
  0x21   :  { %345 = vmatpush3.bf16.msra.mxu0 %v342_v24 }
  0x24   :  { %301 = vmatmul.mubr.f32.vlgmr.msra.gmra.mrb[0].mxu0 %v16_v25 }
  0x25   :  { %303 = vmatprep.mubr.f32.mxu0 %v17_v26 }
  0x28   :  { %304 = vmatmul.mubr.f32.gmra.mrb[2].mxu0 %v18_v27 }
  0xf7   :  { %v302_v29 = vpop.f32.mrb[0].mxu0 }
  0xf8   :  { %v101_v30 = vpop.f32.mrb[1].mxu0 }
  0xf9   :  { %308 = vmatprep.mubr.msk.f32.mxu1 %vm121_vm0, %v101_v30 }
  0xfa   :  { %309 = vmatmul.mubr.msk.f32.vlgmr.msra.gmra.mrb[0].mxu1 %vm121_vm0, %v302_v29 }
  0xfb   :  { %v305_v31 = vpop.f32.mrb[2].mxu0 }
  0xfc   :  { %v111_v32 = vpop.f32.mrb[3].mxu0 }
  0xfd   :  { %311 = vmatprep.mubr.msk.f32.mxu1 %vm121_vm0, %v111_v32 }
  0xfe   :  { %312 = vmatmul.mubr.msk.f32.gmra.mrb[2].mxu1 %vm121_vm0, %v305_v31 }
 0x1cd   :  { %v310_v33 = vpop.f32.mrb[0].mxu1 }
 0x1ce   :  { %220 = vst [vmem:[#allocation2 + $0x8] sm:$0xff] %v310_v33  ;;  %v200_v34 = vpop.f32.mrb[1].mxu1 }
 0x1cf   :  { %219 = vst [vmem:[#allocation2] sm:$0xff] %v200_v34 }
 0x1d1   :  { %v313_v35 = vpop.f32.mrb[2].mxu1 }
 0x1d2   :  { %222 = vst [vmem:[#allocation2 + $0x18] sm:$0xff] %v313_v35  ;;  %v210_v36 = vpop.f32.mrb[3].mxu1 }
 0x1d3   :  { %221 = vst [vmem:[#allocation2 + $0x10] sm:$0xff] %v210_v36 }
 0x1d4   :  { %227 = vsyncadd [#allocation3], 256  ;;  %s373_s0 = smov [#allocation2]  }
 0x1d5   :  { %s228_s2 = sshll.u32 %s373_s0, 4  ;;  %s229_s2 = int_to_ptr.vmem [resolvable:$true] %s228_s2 }
 0x1d6   :  { %s349_s26 = scalar_lea.vmem %s229_s2, 256  ;;  %s353_s27 = scalar_lea.vmem %s229_s2, 512 }
 0x1d7   :  { %p350_p0 = scmp.ne.s32.totalorder %s229_s2, %s349_s26  ;;  %p354_p1 = scmp.lt.s32.totalorder %s229_s2, %s229_s2 }
 0x1d8   :  { %p355_p2 = scmp.lt.s32.totalorder %s353_s27, %s349_s26 }
 0x1da   :  { %p356_p3 = por %p355_p2, %p354_p1 }
 0x1dc   :  { %p357_p4 = pnand %p356_p3, %p350_p0 }
 0x1de   :  { %360 = shalt.err (!%p357_p4)
}
 0x1df   :  { %s361_s30 = scalar_lea.hbm %s474_s3, 256 }
 0x1e0   :  { %p362_p5 = scmp.ne.s32.totalorder %s474_s3, %s361_s30  ;;  %p365_p6 = scmp.lt.u32.totalorder %s361_s30, %s474_s3 }
 0x1e2   :  { %p367_p7 = pnand %p365_p6, %p362_p5 }
 0x1e4   :  { %370 = shalt.err (!%p367_p7)
}
 0x1e5   :  { %s374_s8 = smov 128   ;;  %s375_s9 = smov 8  }
 0x1e6   :  { %234 = dma.vmem_to_hbm [thread:$0]  %s229_s2, 256, %s474_s3, [#allocation3], %s374_s8, %s374_s8, %s375_s9  }
 0x1e7   :  { %371 = dma.done.wait [#allocation3], 512  }
 0x1e8   :  { %372 = vsyncadd [#allocation3], 4294966784 }
 0x1e9   :  { %238 = vsyncpa [#allocation3], 1 }

</bundles_post_ra>
